<compile_context>
chip_gen: v6e
topology: v6e:2x2x1
jax: 0.10.0
libtpu: 0.0.40
codegen_flags: <defaults>
</compile_context>

<pallas_src>
import functools
import math

import jax
import jax.numpy as jnp
from jax.experimental import pallas as pl
from jax.experimental.pallas import tpu as pltpu


# ----------------------------- tunables -------------------------------------
_SMALL_N_LANE = 64        # N <= this -> transposed, lane-dense pairwise kernel
_BISECT_ITERS = 24        # bisection steps before the exact support refinement


@functools.lru_cache(maxsize=1)
def _chip_info():
    """Returns (vmem_capacity_bytes, n_tensorcores) with conservative fallbacks."""
    vmem = 64 * 1024 * 1024            # assume v7x-sized VMEM if the query fails
    cores = 1
    try:
        info = pltpu.get_tpu_info()
        v = getattr(info, "vmem_capacity_bytes", None)
        if v:
            vmem = int(v)
    except Exception:
        pass
    try:
        kind = str(getattr(jax.devices()[0], "device_kind", "")).lower()
        if "v7" in kind or "7x" in kind:
            cores = 2                  # v7x: two TensorCores share the chip
            vmem = min(vmem, 64 * 1024 * 1024)
    except Exception:
        pass
    return vmem, cores


def _round_down8(v):
    return max(8, (v // 8) * 8)


def _vmem_limit(est_bytes, vmem_bytes):
    cap = (vmem_bytes * 3) // 4        # ~96 MiB on v5e/v6e, ~48 MiB on v7x
    return int(min(cap, max(32 * 1024 * 1024, 2 * est_bytes)))


def _bisect_row_tile(rows, n, vmem_bytes, n_cores):
    """Row tile for the bisection kernel (rows on sublanes, N on lanes)."""
    budget = max(vmem_bytes // 16, 2 * 1024 * 1024)   # ~8 MiB v5e/v6e, ~4 MiB v7x
    bytes_per_row = 6 * n * 4                         # in+out double-buffered + f32 temps
    tr = min(1024, _round_down8(budget // max(bytes_per_row, 1)))
    if rows <= tr:
        if n_cores > 1 and rows >= 16 and rows % 16 == 0:
            return rows // 2                          # exactly 2 steps for 2 TensorCores
        return rows                                   # full-dim block (any row count)
    if n_cores > 1:
        tr = min(tr, _round_down8((rows + 1) // 2))   # >= 2 steps on the parallel axis
    if rows % 8 == 0:
        # Prefer a tile that divides rows exactly (no boundary-masked tail block).
        t = tr
        while t >= max(8, tr // 2):
            if rows % t == 0:
                return t
            t -= 8
    return tr


def _transposed_lane_tile(rows, n, vmem_bytes, n_cores):
    """Lane tile for the small-N transposed kernel (rows on the lane axis)."""
    if rows <= 128:
        return rows                                   # full-dim lane block
    lane_tiles = pl.cdiv(rows, 128)
    budget = max(vmem_bytes // 16, 2 * 1024 * 1024)
    cap = 16 if vmem_bytes >= (96 << 20) else 8       # 2048 lanes v5e/v6e, 1024 v7x
    t = max(1, min(cap, budget // (6 * n * 128 * 4)))
    if n_cores > 1 and lane_tiles >= 2:
        t = min(t, max(1, lane_tiles // 2))           # feed both v7x TensorCores
    t = min(t, lane_tiles)
    return 128 * t


# ------------------ kernel 1: small N, transposed (lane-dense) --------------
def _transposed_kernel(x_ref, o_ref):
    """Sparsemax with logits on sublanes and independent rows on the lane axis."""
    x = x_ref[...].astype(jnp.float32)                        # (N, TC)
    z = x - jnp.max(x, axis=0, keepdims=True)                 # (N, TC)
    # t_i = sum_j max(z_j - z_i, 0); i in support <=> t_i < 1 (tie-safe, same as
    # the sort/cumsum test).  Accumulated one sublane row at a time: pure VPU,
    # no (N, N, TC) cube and no per-element cross-lane reduce.
    t = jnp.zeros_like(z)
    for j in range(x_ref.shape[0]):                           # static unroll, N <= 64
        t = t + jnp.maximum(z[j:j + 1, :] - z, 0.0)
    supp = t < 1.0
    k_star = jnp.sum(jnp.where(supp, 1.0, 0.0), axis=0, keepdims=True)   # (1, TC)
    s_sum = jnp.sum(jnp.where(supp, z, 0.0), axis=0, keepdims=True)
    tau = (s_sum - 1.0) / k_star
    o_ref[...] = jnp.maximum(z - tau, 0.0).astype(o_ref.dtype)


def _transposed_call(flat):
    rows, n = flat.shape
    dtype = flat.dtype
    isz = dtype.itemsize
    vmem_bytes, n_cores = _chip_info()
    tc = _transposed_lane_tile(rows, n, vmem_bytes, n_cores)
    grid = (pl.cdiv(rows, tc),)

    # TODO(synk): the wrapper-side transpose is still one extra HBM round trip;
    # folding it into the kernel (on-chip (tc, N) -> (N, tc) transpose) would
    # trade it for non-lane-dense stores of the natural-layout output.
    xt = flat.T                                               # (N, rows): rows on lanes

    est = 8 * n * tc * 4
    cost = pl.CostEstimate(
        flops=int(rows * n * (3 * n + 12)),
        transcendentals=0,
        bytes_accessed=int(2 * rows * n * isz),
    )
    out = pl.pallas_call(
        _transposed_kernel,
        out_shape=jax.ShapeDtypeStruct((n, rows), dtype),
        grid=grid,
        in_specs=[pl.BlockSpec((n, tc), lambda i: (0, i))],
        out_specs=pl.BlockSpec((n, tc), lambda i: (0, i)),
        compiler_params=pltpu.CompilerParams(
            dimension_semantics=("parallel",),
            vmem_limit_bytes=_vmem_limit(est, vmem_bytes),
        ),
        cost_estimate=cost,
    )(xt)
    return out.T


# ------------------ kernel 2: larger N, tau-bisection ------------------------
def _bisect_kernel(x_ref, o_ref, *, iters, use_mxu):
    """Sparsemax via tau bisection (O(iters*N) VPU) + one exact refinement."""
    x = x_ref[...].astype(jnp.float32)                        # (TR, N)
    z = x - jnp.max(x, axis=-1, keepdims=True)                # max(z) == 0 -> tau* in [-1, 0)
    n = x.shape[-1]

    if use_mxu:
        # Push the per-iteration lane sum onto the otherwise-idle MXU.
        ones = jnp.ones((n, 128), jnp.float32)

        def mass_of(mid):
            relu = jnp.maximum(z - mid, 0.0)
            return jnp.dot(relu, ones, preferred_element_type=jnp.float32)[:, :1]
    else:
        def mass_of(mid):
            return jnp.sum(jnp.maximum(z - mid, 0.0), axis=-1, keepdims=True)

    lo0 = jnp.full(z.shape[:-1] + (1,), -1.0, jnp.float32)
    hi0 = jnp.zeros_like(lo0)

    def body(_, carry):
        lo, hi = carry
        mid = 0.5 * (lo + hi)
        go_up = mass_of(mid) > 1.0                            # tau too small -> raise lo
        return jnp.where(go_up, mid, lo), jnp.where(go_up, hi, mid)

    lo, hi = jax.lax.fori_loop(0, iters, body, (lo0, hi0))
    tau_hat = 0.5 * (lo + hi)                                 # strictly < 0 -> row max in support
    supp = z > tau_hat
    k_star = jnp.sum(jnp.where(supp, 1.0, 0.0), axis=-1, keepdims=True)
    s_sum = jnp.sum(jnp.where(supp, z, 0.0), axis=-1, keepdims=True)
    tau = (s_sum - 1.0) / k_star                              # exact, matches sort/cumsum ref
    o_ref[...] = jnp.maximum(z - tau, 0.0).astype(o_ref.dtype)


def _bisect_call(flat):
    rows, n = flat.shape
    dtype = flat.dtype
    isz = dtype.itemsize
    vmem_bytes, n_cores = _chip_info()
    tr = _bisect_row_tile(rows, n, vmem_bytes, n_cores)
    grid = (pl.cdiv(rows, tr),)
    use_mxu = (n % 128 == 0)

    kern = functools.partial(_bisect_kernel, iters=_BISECT_ITERS, use_mxu=use_mxu)
    est = 10 * tr * n * 4
    cost = pl.CostEstimate(
        flops=int(rows * n * (5 * _BISECT_ITERS + 12)),
        transcendentals=0,
        bytes_accessed=int(2 * rows * n * isz),
    )
    return pl.pallas_call(
        kern,
        out_shape=jax.ShapeDtypeStruct((rows, n), dtype),
        grid=grid,
        in_specs=[pl.BlockSpec((tr, n), lambda i: (i, 0))],
        out_specs=pl.BlockSpec((tr, n), lambda i: (i, 0)),
        compiler_params=pltpu.CompilerParams(
            dimension_semantics=("parallel",),
            vmem_limit_bytes=_vmem_limit(est, vmem_bytes),
        ),
        cost_estimate=cost,
    )(flat)


# ----------------------------- public wrapper --------------------------------
def sparsemax_pallas(x, dim=-1):
    """Sparsemax over `dim` (default -1), matching SparseMax_good.forward."""
    x = jnp.asarray(x)
    dim = dim % x.ndim
    xm = jnp.moveaxis(x, dim, -1)
    moved_shape = xm.shape
    n = moved_shape[-1]
    rows = int(math.prod(moved_shape[:-1])) if len(moved_shape) > 1 else 1
    flat = xm.reshape(rows, n)

    if n <= _SMALL_N_LANE:
        out = _transposed_call(flat)
    else:
        out = _bisect_call(flat)

    return jnp.moveaxis(out.reshape(moved_shape), -1, dim)


def sparsemax_ref(x, dim=-1):
    """Pure-JAX reference: direct transcription of the PyTorch sort-based code."""
    dim = dim % x.ndim
    z = jnp.moveaxis(x, dim, -1)
    shape = z.shape
    z2 = z.reshape(-1, shape[-1]).astype(jnp.float32)
    z2 = z2 - jnp.max(z2, axis=-1, keepdims=True)
    zs = -jnp.sort(-z2, axis=-1)
    n = shape[-1]
    rng = jnp.arange(1, n + 1, dtype=z2.dtype)[None, :]
    bound = 1.0 + rng * zs
    cum = jnp.cumsum(zs, axis=-1)
    is_gt = (bound > cum).astype(z2.dtype)
    k = jnp.max(is_gt * rng, axis=-1, keepdims=True)
    taus = (jnp.sum(is_gt * zs, axis=-1, keepdims=True) - 1.0) / k
    out = jnp.maximum(z2 - taus, 0.0).astype(x.dtype)
    return jnp.moveaxis(out.reshape(shape), -1, dim)


if __name__ == "__main__":
    key = jax.random.PRNGKey(0)
    k0, k1, k2, k3, k4 = jax.random.split(key, 5)

    # Primary case (module default dim=-1): small logit axis (N=16) -> transposed
    # lane-dense kernel.
    x0 = jax.random.normal(k0, (2, 4, 16, 16), dtype=jnp.float32) * 3.0
    out0 = jax.block_until_ready(sparsemax_pallas(x0, dim=-1))
    assert out0.shape == x0.shape and out0.dtype == x0.dtype
    assert jnp.allclose(jnp.sum(out0, axis=-1), 1.0, atol=1e-4)
    assert jnp.allclose(out0, sparsemax_ref(x0, dim=-1), atol=2e-5, rtol=2e-5)

    # N in (32, 64]: newly routed to the transposed kernel.
    x1 = jax.random.normal(k1, (256, 48), dtype=jnp.float32) * 2.0
    out1 = jax.block_until_ready(sparsemax_pallas(x1))
    assert jnp.allclose(out1, sparsemax_ref(x1), atol=2e-5, rtol=2e-5)

    # Mid-size logit axis (multiple of 128): bisection kernel, MXU lane-sum path.
    x2 = jax.random.normal(k2, (16, 384), dtype=jnp.float32)
    out2 = jax.block_until_ready(sparsemax_pallas(x2))
    assert jnp.allclose(out2, sparsemax_ref(x2), atol=2e-5, rtol=2e-5)

    # Non-multiple-of-128 logit axis and non-default dim: bisection, jnp.sum path,
    # full-dim (unpadded) blocks.
    x3 = jax.random.normal(k3, (300, 2, 6), dtype=jnp.float32) * 2.0
    out3 = jax.block_until_ready(sparsemax_pallas(x3, dim=0))
    assert jnp.allclose(out3, sparsemax_ref(x3, dim=0), atol=2e-5, rtol=2e-5)

    # Larger row count: bisection with a big row tile (and 2 grid steps on v7x).
    x4 = jax.random.normal(k4, (1024, 256), dtype=jnp.float32)
    out4 = jax.block_until_ready(sparsemax_pallas(x4))
    assert jnp.allclose(out4, sparsemax_ref(x4), atol=2e-5, rtol=2e-5)

    print("KERNEL_OK")
</pallas_src>

<mosaic_0001>
module attributes {stable_mosaic.version = 11 : i64} {
  func.func @_transposed_kernel(%arg0: i32, %arg1: memref<16x128xf32, #tpu.memory_space<vmem>>, %arg2: memref<16x128xf32, #tpu.memory_space<vmem>>) attributes {dimension_semantics = [#tpu.dimension_semantics<parallel>], iteration_bounds = array<i64: 1>, scalar_prefetch = 0 : i64, scratch_operands = 0 : i64, tpu.core_type = #tpu.core_type<tc>, window_params = [{transform_indices = @transform_0, window_bounds = array<i64: 16, 128>}, {transform_indices = @transform_1, window_bounds = array<i64: 16, 128>}]} {
    %c0 = arith.constant 0 : index
    %c0_0 = arith.constant 0 : index
    %0 = vector.load %arg1[%c0, %c0_0] : memref<16x128xf32, #tpu.memory_space<vmem>>, vector<16x128xf32>
    %cst = arith.constant dense<0xFF800000> : vector<128xf32>
    %1 = vector.multi_reduction <maximumf>, %0, %cst [0] : vector<16x128xf32> to vector<128xf32>
    %2 = vector.shape_cast %1 : vector<128xf32> to vector<1x128xf32>
    %3 = vector.broadcast %2 : vector<1x128xf32> to vector<16x128xf32>
    %4 = arith.subf %0, %3 : vector<16x128xf32>
    %cst_1 = arith.constant 0.000000e+00 : f32
    %5 = vector.broadcast %cst_1 : f32 to vector<16x128xf32>
    %6 = vector.extract_strided_slice %4 {offsets = [0, 0], sizes = [1, 128], strides = [1, 1]} : vector<16x128xf32> to vector<1x128xf32>
    %7 = vector.broadcast %6 : vector<1x128xf32> to vector<16x128xf32>
    %8 = arith.subf %7, %4 : vector<16x128xf32>
    %cst_2 = arith.constant 0.000000e+00 : f32
    %9 = vector.broadcast %cst_2 : f32 to vector<16x128xf32>
    %10 = arith.maximumf %8, %9 : vector<16x128xf32>
    %11 = arith.addf %5, %10 : vector<16x128xf32>
    %12 = vector.extract_strided_slice %4 {offsets = [1, 0], sizes = [1, 128], strides = [1, 1]} : vector<16x128xf32> to vector<1x128xf32>
    %13 = vector.broadcast %12 : vector<1x128xf32> to vector<16x128xf32>
    %14 = arith.subf %13, %4 : vector<16x128xf32>
    %cst_3 = arith.constant 0.000000e+00 : f32
    %15 = vector.broadcast %cst_3 : f32 to vector<16x128xf32>
    %16 = arith.maximumf %14, %15 : vector<16x128xf32>
    %17 = arith.addf %11, %16 : vector<16x128xf32>
    %18 = vector.extract_strided_slice %4 {offsets = [2, 0], sizes = [1, 128], strides = [1, 1]} : vector<16x128xf32> to vector<1x128xf32>
    %19 = vector.broadcast %18 : vector<1x128xf32> to vector<16x128xf32>
    %20 = arith.subf %19, %4 : vector<16x128xf32>
    %cst_4 = arith.constant 0.000000e+00 : f32
    %21 = vector.broadcast %cst_4 : f32 to vector<16x128xf32>
    %22 = arith.maximumf %20, %21 : vector<16x128xf32>
    %23 = arith.addf %17, %22 : vector<16x128xf32>
    %24 = vector.extract_strided_slice %4 {offsets = [3, 0], sizes = [1, 128], strides = [1, 1]} : vector<16x128xf32> to vector<1x128xf32>
    %25 = vector.broadcast %24 : vector<1x128xf32> to vector<16x128xf32>
    %26 = arith.subf %25, %4 : vector<16x128xf32>
    %cst_5 = arith.constant 0.000000e+00 : f32
    %27 = vector.broadcast %cst_5 : f32 to vector<16x128xf32>
    %28 = arith.maximumf %26, %27 : vector<16x128xf32>
    %29 = arith.addf %23, %28 : vector<16x128xf32>
    %30 = vector.extract_strided_slice %4 {offsets = [4, 0], sizes = [1, 128], strides = [1, 1]} : vector<16x128xf32> to vector<1x128xf32>
    %31 = vector.broadcast %30 : vector<1x128xf32> to vector<16x128xf32>
    %32 = arith.subf %31, %4 : vector<16x128xf32>
    %cst_6 = arith.constant 0.000000e+00 : f32
    %33 = vector.broadcast %cst_6 : f32 to vector<16x128xf32>
    %34 = arith.maximumf %32, %33 : vector<16x128xf32>
    %35 = arith.addf %29, %34 : vector<16x128xf32>
    %36 = vector.extract_strided_slice %4 {offsets = [5, 0], sizes = [1, 128], strides = [1, 1]} : vector<16x128xf32> to vector<1x128xf32>
    %37 = vector.broadcast %36 : vector<1x128xf32> to vector<16x128xf32>
    %38 = arith.subf %37, %4 : vector<16x128xf32>
    %cst_7 = arith.constant 0.000000e+00 : f32
    %39 = vector.broadcast %cst_7 : f32 to vector<16x128xf32>
    %40 = arith.maximumf %38, %39 : vector<16x128xf32>
    %41 = arith.addf %35, %40 : vector<16x128xf32>
    %42 = vector.extract_strided_slice %4 {offsets = [6, 0], sizes = [1, 128], strides = [1, 1]} : vector<16x128xf32> to vector<1x128xf32>
    %43 = vector.broadcast %42 : vector<1x128xf32> to vector<16x128xf32>
    %44 = arith.subf %43, %4 : vector<16x128xf32>
    %cst_8 = arith.constant 0.000000e+00 : f32
    %45 = vector.broadcast %cst_8 : f32 to vector<16x128xf32>
    %46 = arith.maximumf %44, %45 : vector<16x128xf32>
    %47 = arith.addf %41, %46 : vector<16x128xf32>
    %48 = vector.extract_strided_slice %4 {offsets = [7, 0], sizes = [1, 128], strides = [1, 1]} : vector<16x128xf32> to vector<1x128xf32>
    %49 = vector.broadcast %48 : vector<1x128xf32> to vector<16x128xf32>
    %50 = arith.subf %49, %4 : vector<16x128xf32>
    %cst_9 = arith.constant 0.000000e+00 : f32
    %51 = vector.broadcast %cst_9 : f32 to vector<16x128xf32>
    %52 = arith.maximumf %50, %51 : vector<16x128xf32>
    %53 = arith.addf %47, %52 : vector<16x128xf32>
    %54 = vector.extract_strided_slice %4 {offsets = [8, 0], sizes = [1, 128], strides = [1, 1]} : vector<16x128xf32> to vector<1x128xf32>
    %55 = vector.broadcast %54 : vector<1x128xf32> to vector<16x128xf32>
    %56 = arith.subf %55, %4 : vector<16x128xf32>
    %cst_10 = arith.constant 0.000000e+00 : f32
    %57 = vector.broadcast %cst_10 : f32 to vector<16x128xf32>
    %58 = arith.maximumf %56, %57 : vector<16x128xf32>
    %59 = arith.addf %53, %58 : vector<16x128xf32>
    %60 = vector.extract_strided_slice %4 {offsets = [9, 0], sizes = [1, 128], strides = [1, 1]} : vector<16x128xf32> to vector<1x128xf32>
    %61 = vector.broadcast %60 : vector<1x128xf32> to vector<16x128xf32>
    %62 = arith.subf %61, %4 : vector<16x128xf32>
    %cst_11 = arith.constant 0.000000e+00 : f32
    %63 = vector.broadcast %cst_11 : f32 to vector<16x128xf32>
    %64 = arith.maximumf %62, %63 : vector<16x128xf32>
    %65 = arith.addf %59, %64 : vector<16x128xf32>
    %66 = vector.extract_strided_slice %4 {offsets = [10, 0], sizes = [1, 128], strides = [1, 1]} : vector<16x128xf32> to vector<1x128xf32>
    %67 = vector.broadcast %66 : vector<1x128xf32> to vector<16x128xf32>
    %68 = arith.subf %67, %4 : vector<16x128xf32>
    %cst_12 = arith.constant 0.000000e+00 : f32
    %69 = vector.broadcast %cst_12 : f32 to vector<16x128xf32>
    %70 = arith.maximumf %68, %69 : vector<16x128xf32>
    %71 = arith.addf %65, %70 : vector<16x128xf32>
    %72 = vector.extract_strided_slice %4 {offsets = [11, 0], sizes = [1, 128], strides = [1, 1]} : vector<16x128xf32> to vector<1x128xf32>
    %73 = vector.broadcast %72 : vector<1x128xf32> to vector<16x128xf32>
    %74 = arith.subf %73, %4 : vector<16x128xf32>
    %cst_13 = arith.constant 0.000000e+00 : f32
    %75 = vector.broadcast %cst_13 : f32 to vector<16x128xf32>
    %76 = arith.maximumf %74, %75 : vector<16x128xf32>
    %77 = arith.addf %71, %76 : vector<16x128xf32>
    %78 = vector.extract_strided_slice %4 {offsets = [12, 0], sizes = [1, 128], strides = [1, 1]} : vector<16x128xf32> to vector<1x128xf32>
    %79 = vector.broadcast %78 : vector<1x128xf32> to vector<16x128xf32>
    %80 = arith.subf %79, %4 : vector<16x128xf32>
    %cst_14 = arith.constant 0.000000e+00 : f32
    %81 = vector.broadcast %cst_14 : f32 to vector<16x128xf32>
    %82 = arith.maximumf %80, %81 : vector<16x128xf32>
    %83 = arith.addf %77, %82 : vector<16x128xf32>
    %84 = vector.extract_strided_slice %4 {offsets = [13, 0], sizes = [1, 128], strides = [1, 1]} : vector<16x128xf32> to vector<1x128xf32>
    %85 = vector.broadcast %84 : vector<1x128xf32> to vector<16x128xf32>
    %86 = arith.subf %85, %4 : vector<16x128xf32>
    %cst_15 = arith.constant 0.000000e+00 : f32
    %87 = vector.broadcast %cst_15 : f32 to vector<16x128xf32>
    %88 = arith.maximumf %86, %87 : vector<16x128xf32>
    %89 = arith.addf %83, %88 : vector<16x128xf32>
    %90 = vector.extract_strided_slice %4 {offsets = [14, 0], sizes = [1, 128], strides = [1, 1]} : vector<16x128xf32> to vector<1x128xf32>
    %91 = vector.broadcast %90 : vector<1x128xf32> to vector<16x128xf32>
    %92 = arith.subf %91, %4 : vector<16x128xf32>
    %cst_16 = arith.constant 0.000000e+00 : f32
    %93 = vector.broadcast %cst_16 : f32 to vector<16x128xf32>
    %94 = arith.maximumf %92, %93 : vector<16x128xf32>
    %95 = arith.addf %89, %94 : vector<16x128xf32>
    %96 = vector.extract_strided_slice %4 {offsets = [15, 0], sizes = [1, 128], strides = [1, 1]} : vector<16x128xf32> to vector<1x128xf32>
    %97 = vector.broadcast %96 : vector<1x128xf32> to vector<16x128xf32>
    %98 = arith.subf %97, %4 : vector<16x128xf32>
    %cst_17 = arith.constant 0.000000e+00 : f32
    %99 = vector.broadcast %cst_17 : f32 to vector<16x128xf32>
    %100 = arith.maximumf %98, %99 : vector<16x128xf32>
    %101 = arith.addf %95, %100 : vector<16x128xf32>
    %cst_18 = arith.constant 1.000000e+00 : f32
    %102 = vector.broadcast %cst_18 : f32 to vector<16x128xf32>
    %103 = arith.cmpf olt, %101, %102 : vector<16x128xf32>
    %cst_19 = arith.constant 1.000000e+00 : f32
    %cst_20 = arith.constant 0.000000e+00 : f32
    %104 = vector.broadcast %cst_19 : f32 to vector<16x128xf32>
    %105 = vector.broadcast %cst_20 : f32 to vector<16x128xf32>
    %106 = arith.select %103, %104, %105 : vector<16x128xi1>, vector<16x128xf32>
    %cst_21 = arith.constant dense<0.000000e+00> : vector<128xf32>
    %107 = vector.multi_reduction <add>, %106, %cst_21 [0] : vector<16x128xf32> to vector<128xf32>
    %108 = vector.shape_cast %107 : vector<128xf32> to vector<1x128xf32>
    %cst_22 = arith.constant 0.000000e+00 : f32
    %109 = vector.broadcast %cst_22 : f32 to vector<16x128xf32>
    %110 = arith.select %103, %4, %109 : vector<16x128xi1>, vector<16x128xf32>
    %cst_23 = arith.constant dense<0.000000e+00> : vector<128xf32>
    %111 = vector.multi_reduction <add>, %110, %cst_23 [0] : vector<16x128xf32> to vector<128xf32>
    %112 = vector.shape_cast %111 : vector<128xf32> to vector<1x128xf32>
    %cst_24 = arith.constant 1.000000e+00 : f32
    %113 = vector.broadcast %cst_24 : f32 to vector<1x128xf32>
    %114 = arith.subf %112, %113 : vector<1x128xf32>
    %115 = arith.divf %114, %108 : vector<1x128xf32>
    %116 = vector.broadcast %115 : vector<1x128xf32> to vector<16x128xf32>
    %117 = arith.subf %4, %116 : vector<16x128xf32>
    %cst_25 = arith.constant 0.000000e+00 : f32
    %118 = vector.broadcast %cst_25 : f32 to vector<16x128xf32>
    %119 = arith.maximumf %117, %118 : vector<16x128xf32>
    %c0_26 = arith.constant 0 : index
    %c0_27 = arith.constant 0 : index
    %120 = vector.load %arg2[%c0_26, %c0_27] : memref<16x128xf32, #tpu.memory_space<vmem>>, vector<16x128xf32>
    tpu.vector_store %arg2[%c0_26, %c0_27], %119 {strides = array<i32>} : memref<16x128xf32, #tpu.memory_space<vmem>>, vector<16x128xf32>,
    return
  }
  func.func @transform_0(%arg0: i32) -> (i32, i32) {
    %c0_i32 = arith.constant 0 : i32
    %c0_i32_0 = arith.constant 0 : i32
    return %c0_i32, %arg0 : i32, i32
  }
  func.func @transform_1(%arg0: i32) -> (i32, i32) {
    %c0_i32 = arith.constant 0 : i32
    %c0_i32_0 = arith.constant 0 : i32
    return %c0_i32, %arg0 : i32, i32
  }
}

</mosaic_0001>

<bundles_post_ra>
// kernel: tpu_custom_call.1
= control target key start
LH: loop header
LB: loop body
LE: loop exit
PB: predicated region body
PF: predicated region fallthrough
CT: control target
= control target key end

     0   :  { %6 = vsyncpa [#allocation3], 0  ;;  %s401_s0 = inlined_call_operand.hbm [shape: f32[16,128], index: 0, kind: input, shape index: {}]   ;;  %s402_s1 = inlined_call_operand.hbm [shape: f32[16,128], index: 1, kind: output, shape index: {}]  }
   0x1   :  { %7 = vsyncpa [#allocation4], 0  ;;  %s292_s6 = smov [#allocation2]  }
   0x2   :  { %s13_s7 = sshll.u32 %s292_s6, 4  ;;  %s14_s7 = int_to_ptr.vmem [resolvable:$true] %s13_s7 }
   0x3   :  { %s256_s8 = scalar_lea.vmem %s14_s7, 256  ;;  %p261_p1 = scmp.lt.s32.totalorder %s14_s7, %s14_s7 }
   0x4   :  { %p257_p0 = scmp.ne.s32.totalorder %s14_s7, %s256_s8  ;;  %p262_p2 = scmp.lt.s32.totalorder %s256_s8, %s256_s8 }
   0x6   :  { %p263_p3 = por %p262_p2, %p261_p1 }
   0x8   :  { %p264_p4 = pnand %p263_p3, %p257_p0 }
   0xa   :  { %267 = shalt.err (!%p264_p4)
}
   0xb   :  { %s293_s9 = smov 128   ;;  %s294_s10 = smov 8  }
   0xc   :  { %19 = dma.hbm_to_vmem [thread:$0]  %s401_s0, 256, %s14_s7, [#allocation3], %s293_s9, %s293_s9, %s294_s10  }
   0xd   :  { %288 = dma.done.wait [#allocation3], 256  }
   0xe   :  { %289 = vsyncadd [#allocation3], 4294967040  ;;  %v23_v0 = vld [vmem:[#allocation2] sm:$0xff]  ;;  %v24_v1 = vld [vmem:[#allocation2 + $0x8] sm:$0xff]  ;;  %v34_v4 = vlaneseq  ;;  %s296_s0 = smov [#allocation5]  }
   0xf   :  { %v25_v2 = vmax.f32 %v23_v0, %v24_v1  ;;  %s228_s13 = sshll.u32 %s296_s0, 4  ;;  %s229_s13 = int_to_ptr.vmem [resolvable:$true] %s228_s13 }
  0x10   :  { %v313_v7 = vshrl.u32 %v34_v4, 7  ;;  %s268_s14 = scalar_lea.vmem %s229_s13, 256  ;;  %p273_p6 = scmp.lt.s32.totalorder %s229_s13, %s229_s13 }
  0x11   :  { %v26_v3 = vrot.slane %v25_v2, 4  ;;  %p269_p5 = scmp.ne.s32.totalorder %s229_s13, %s268_s14  ;;  %p274_p7 = scmp.lt.s32.totalorder %s268_s14, %s268_s14 }
  0x12   :  { %v36_v10 = vsub.s32 0, %v313_v7  ;;  %v46_v12 = vsub.s32 1, %v313_v7  ;;  %v56_v13 = vsub.s32 2, %v313_v7  ;;  %v66_v14 = vsub.s32 3, %v313_v7 }
  0x13   :  { %v27_v5 = vmax.f32 %v25_v2, %v26_v3  ;;  %v76_v15 = vsub.s32 4, %v313_v7  ;;  %v86_v16 = vsub.s32 5, %v313_v7  ;;  %v96_v17 = vsub.s32 6, %v313_v7  ;;  %p275_p8 = por %p274_p7, %p273_p6 }
  0x14   :  { %v106_v18 = vsub.s32 7, %v313_v7 }
  0x15   :  { %v28_v6 = vrot.slane %v27_v5, 2  ;;  %p276_p9 = pnand %p275_p8, %p269_p5 }
  0x17   :  { %v29_v8 = vmax.f32 %v27_v5, %v28_v6 }
  0x19   :  { %v30_v9 = vrot.slane %v29_v8, 1 }
  0x1b   :  { %v31_v11 = vmax.f32 %v29_v8, %v30_v9 }
  0x1d   :  { %v323_v19 = vsub.f32 %v23_v0, %v31_v11  ;;  %v325_v20 = vsub.f32 %v24_v1, %v31_v11 }
  0x1f   :  { %v37_v21 = vrot.slane %v323_v19, %v36_v10  ;;  %v47_v22 = vrot.slane %v323_v19, %v46_v12  ;;  %v57_v23 = vrot.slane %v323_v19, %v56_v13  ;;  %v67_v24 = vrot.slane %v323_v19, %v66_v14 }
  0x20   :  { %v77_v25 = vrot.slane %v323_v19, %v76_v15  ;;  %v87_v26 = vrot.slane %v323_v19, %v86_v16  ;;  %v97_v27 = vrot.slane %v323_v19, %v96_v17  ;;  %v107_v28 = vrot.slane %v323_v19, %v106_v18 }
  0x21   :  { %v38_v29 = vsub.f32 %v37_v21, %v323_v19  ;;  %v39_v30 = vsub.f32 %v37_v21, %v325_v20  ;;  %v48_v31 = vsub.f32 %v47_v22, %v323_v19  ;;  %v49_v32 = vsub.f32 %v47_v22, %v325_v20 }
  0x22   :  { %v58_v33 = vsub.f32 %v57_v23, %v323_v19  ;;  %v59_v34 = vsub.f32 %v57_v23, %v325_v20  ;;  %v68_v35 = vsub.f32 %v67_v24, %v323_v19  ;;  %v69_v36 = vsub.f32 %v67_v24, %v325_v20 }
  0x23   :  { %v40_v37 = vmax.f32 %v38_v29, 0.0  ;;  %v41_v38 = vmax.f32 %v39_v30, 0.0  ;;  %v50_v39 = vmax.f32 %v48_v31, 0.0  ;;  %v51_v40 = vmax.f32 %v49_v32, 0.0 }
  0x24   :  { %v60_v41 = vmax.f32 %v58_v33, 0.0  ;;  %v61_v42 = vmax.f32 %v59_v34, 0.0  ;;  %v70_v43 = vmax.f32 %v68_v35, 0.0  ;;  %v71_v44 = vmax.f32 %v69_v36, 0.0 }
  0x25   :  { %v52_v45 = vadd.f32 %v50_v39, %v40_v37  ;;  %v53_v46 = vadd.f32 %v51_v40, %v41_v38  ;;  %v78_v47 = vsub.f32 %v77_v25, %v323_v19  ;;  %v79_v48 = vsub.f32 %v77_v25, %v325_v20 }
  0x26   :  { %v88_v49 = vsub.f32 %v87_v26, %v323_v19  ;;  %v89_v50 = vsub.f32 %v87_v26, %v325_v20  ;;  %v98_v51 = vsub.f32 %v97_v27, %v323_v19  ;;  %v99_v52 = vsub.f32 %v97_v27, %v325_v20 }
  0x27   :  { %v62_v53 = vadd.f32 %v60_v41, %v52_v45  ;;  %v63_v54 = vadd.f32 %v61_v42, %v53_v46  ;;  %v80_v55 = vmax.f32 %v78_v47, 0.0  ;;  %v81_v56 = vmax.f32 %v79_v48, 0.0 }
  0x28   :  { %v90_v57 = vmax.f32 %v88_v49, 0.0  ;;  %v91_v58 = vmax.f32 %v89_v50, 0.0  ;;  %v108_v61 = vsub.f32 %v107_v28, %v323_v19  ;;  %v109_v62 = vsub.f32 %v107_v28, %v325_v20 }
  0x29   :  { %v72_v59 = vadd.f32 %v70_v43, %v62_v53  ;;  %v73_v60 = vadd.f32 %v71_v44, %v63_v54  ;;  %v100_v63 = vmax.f32 %v98_v51, 0.0  ;;  %v117_v0 = vrot.slane %v325_v20, %v36_v10 }
  0x2a   :  { %v127_v1 = vrot.slane %v325_v20, %v46_v12  ;;  %v137_v2 = vrot.slane %v325_v20, %v56_v13  ;;  %v101_v5 = vmax.f32 %v99_v52, 0.0  ;;  %v147_v6 = vrot.slane %v325_v20, %v66_v14 }
  0x2b   :  { %v82_v3 = vadd.f32 %v80_v55, %v72_v59  ;;  %v83_v4 = vadd.f32 %v81_v56, %v73_v60  ;;  %v118_v8 = vsub.f32 %v117_v0, %v323_v19  ;;  %v119_v9 = vsub.f32 %v117_v0, %v325_v20 }
  0x2c   :  { %v128_v11 = vsub.f32 %v127_v1, %v323_v19  ;;  %v129_v21 = vsub.f32 %v127_v1, %v325_v20  ;;  %v110_v10 = vmax.f32 %v108_v61, 0.0  ;;  %v111_v24 = vmax.f32 %v109_v62, 0.0 }
  0x2d   :  { %v92_v22 = vadd.f32 %v90_v57, %v82_v3  ;;  %v93_v23 = vadd.f32 %v91_v58, %v83_v4  ;;  %v138_v12 = vsub.f32 %v137_v2, %v323_v19  ;;  %v139_v13 = vsub.f32 %v137_v2, %v325_v20 }
  0x2e   :  { %v120_v27 = vmax.f32 %v118_v8, 0.0  ;;  %v121_v14 = vmax.f32 %v119_v9, 0.0  ;;  %v130_v28 = vmax.f32 %v128_v11, 0.0  ;;  %v131_v29 = vmax.f32 %v129_v21, 0.0 }
  0x2f   :  { %v102_v25 = vadd.f32 %v100_v63, %v92_v22  ;;  %v103_v26 = vadd.f32 %v101_v5, %v93_v23  ;;  %v157_v30 = vrot.slane %v325_v20, %v76_v15  ;;  %v167_v31 = vrot.slane %v325_v20, %v86_v16 }
  0x30   :  { %v148_v34 = vsub.f32 %v147_v6, %v323_v19  ;;  %v149_v35 = vsub.f32 %v147_v6, %v325_v20  ;;  %v140_v36 = vmax.f32 %v138_v12, 0.0  ;;  %v141_v41 = vmax.f32 %v139_v13, 0.0 }
  0x31   :  { %v112_v32 = vadd.f32 %v110_v10, %v102_v25  ;;  %v113_v33 = vadd.f32 %v111_v24, %v103_v26  ;;  %v158_v37 = vsub.f32 %v157_v30, %v323_v19  ;;  %v159_v38 = vsub.f32 %v157_v30, %v325_v20 }
  0x32   :  { %v177_v15 = vrot.slane %v325_v20, %v96_v17  ;;  %v168_v16 = vsub.f32 %v167_v31, %v323_v19  ;;  %v169_v42 = vsub.f32 %v167_v31, %v325_v20  ;;  %v187_v43 = vrot.slane %v325_v20, %v106_v18 }
  0x33   :  { %v122_v39 = vadd.f32 %v120_v27, %v112_v32  ;;  %v123_v40 = vadd.f32 %v121_v14, %v113_v33  ;;  %v150_v46 = vmax.f32 %v148_v34, 0.0  ;;  %v151_v47 = vmax.f32 %v149_v35, 0.0 }
  0x34   :  { %v160_v48 = vmax.f32 %v158_v37, 0.0  ;;  %v161_v49 = vmax.f32 %v159_v38, 0.0  ;;  %v178_v52 = vsub.f32 %v177_v15, %v323_v19  ;;  %v179_v17 = vsub.f32 %v177_v15, %v325_v20 }
  0x35   :  { %v132_v44 = vadd.f32 %v130_v28, %v122_v39  ;;  %v133_v45 = vadd.f32 %v131_v29, %v123_v40  ;;  %v170_v53 = vmax.f32 %v168_v16, 0.0  ;;  %v171_v54 = vmax.f32 %v169_v42, 0.0 }
  0x36   :  { %v188_v7 = vsub.f32 %v187_v43, %v323_v19  ;;  %v189_v18 = vsub.f32 %v187_v43, %v325_v20  ;;  %v180_v59 = vmax.f32 %v178_v52, 0.0  ;;  %v181_v60 = vmax.f32 %v179_v17, 0.0 }
  0x37   :  { %v142_v50 = vadd.f32 %v140_v36, %v132_v44  ;;  %v143_v51 = vadd.f32 %v141_v41, %v133_v45  ;;  %v295_v5 = vmov 0.0  }
  0x38   :  { %v190_v63 = vmax.f32 %v188_v7, 0.0  ;;  %v191_v0 = vmax.f32 %v189_v18, 0.0 }
  0x39   :  { %v152_v55 = vadd.f32 %v150_v46, %v142_v50  ;;  %v153_v56 = vadd.f32 %v151_v47, %v143_v51 }
  0x3b   :  { %v162_v57 = vadd.f32 %v160_v48, %v152_v55  ;;  %v163_v58 = vadd.f32 %v161_v49, %v153_v56 }
  0x3d   :  { %v172_v61 = vadd.f32 %v170_v53, %v162_v57  ;;  %v173_v62 = vadd.f32 %v171_v54, %v163_v58 }
  0x3f   :  { %v182_v1 = vadd.f32 %v180_v59, %v172_v61  ;;  %v183_v2 = vadd.f32 %v181_v60, %v173_v62 }
  0x41   :  { %v192_v3 = vadd.f32 %v190_v63, %v182_v1  ;;  %v193_v4 = vadd.f32 %v191_v0, %v183_v2 }
  0x43   :  { %vm194_vm0 = vcmp.lt.f32.partialorder %v192_v3, 1.0  ;;  %vm195_vm1 = vcmp.lt.f32.partialorder %v193_v4, 1.0 }
  0x44   :  { %v196_v6 = vsel %vm194_vm0, 1.0, %v295_v5  ;;  %v197_v8 = vsel %vm195_vm1, 1.0, %v295_v5  ;;  %v205_v9 = vsel %vm194_vm0, %v323_v19, 0.0  ;;  %v206_v11 = vsel %vm195_vm1, %v325_v20, 0.0 }
  0x45   :  { %v198_v21 = vadd.f32 %v197_v8, %v196_v6  ;;  %v207_v22 = vadd.f32 %v206_v11, %v205_v9 }
  0x47   :  { %v199_v23 = vrot.slane %v198_v21, 4  ;;  %v208_v10 = vrot.slane %v207_v22, 4 }
  0x49   :  { %v200_v24 = vadd.f32 %v199_v23, %v198_v21  ;;  %v209_v12 = vadd.f32 %v208_v10, %v207_v22 }
  0x4b   :  { %v201_v13 = vrot.slane %v200_v24, 2  ;;  %v210_v26 = vrot.slane %v209_v12, 2 }
  0x4d   :  { %v202_v25 = vadd.f32 %v201_v13, %v200_v24  ;;  %v211_v28 = vadd.f32 %v210_v26, %v209_v12 }
  0x4f   :  { %v203_v27 = vrot.slane %v202_v25, 1  ;;  %v212_v29 = vrot.slane %v211_v28, 1 }
  0x51   :  { %v204_v14 = vadd.f32 %v203_v27, %v202_v25  ;;  %v213_v30 = vadd.f32 %v212_v29, %v211_v28 }
  0x53   :  { %246 = vrcp.f32 %v204_v14  ;;  %v240_v31 = vadd.f32 -1.0, %v213_v30 }
  0x60   :  { %v247_v32 = vpop.eup %246 }
  0x61   :  { %v216_v33 = vmul.f32 %v247_v32, %v240_v31 }
  0x63   :  { %v217_v34 = vsub.f32 %v323_v19, %v216_v33  ;;  %v218_v35 = vsub.f32 %v325_v20, %v216_v33 }
  0x65   :  { %v219_v36 = vmax.f32 %v217_v34, 0.0  ;;  %v220_v37 = vmax.f32 %v218_v35, 0.0 }
  0x67   :  { %221 = vst [vmem:[#allocation5] sm:$0xff] %v219_v36  ;;  %222 = vst [vmem:[#allocation5 + $0x8] sm:$0xff] %v220_v37 }
  0x68   :  { %279 = shalt.err (!%p276_p9)
}
  0x69   :  { %234 = dma.vmem_to_hbm [thread:$0]  %s229_s13, 256, %s402_s1, [#allocation4], %s293_s9, %s293_s9, %s294_s10  }
  0x6a   :  { %290 = dma.done.wait [#allocation4], 256  }
  0x6b   :  { %291 = vsyncadd [#allocation4], 4294967040 }
  0x6c   :  { %238 = vsyncpa [#allocation3], 1 }
  0x6d   :  { %239 = vsyncpa [#allocation4], 1 }

</bundles_post_ra>
